<compile_context>
chip_gen: v7x
topology: tpu7x:2x2x1
jax: 0.10.0
libtpu: 0.0.40
codegen_flags: <defaults>
</compile_context>

<pallas_src>
import functools

import jax
import jax.numpy as jnp
from jax.experimental import pallas as pl
from jax.experimental.pallas import tpu as pltpu


def _mlp_kernel(x_ref, w1_ref, b1_ref, w2_ref, b2_ref, wot_ref, bo_ref, out_ref,
                *, bf16_act):
    # x: (1, TB) f32 — batch on the lane axis.
    x = x_ref[...]

    # fc1 (in_features == 1): VPU broadcast multiply, no MXU involvement.
    #   (64, 1) * (1, TB) + (64, 1) -> (64, TB)
    h = jnp.tanh(w1_ref[...] * x + b1_ref[...])
    if bf16_act:
        h = h.astype(jnp.bfloat16)

    # fc2 applied three times (shared weights): bf16 MXU matmuls with f32
    # accumulation; bias add in f32; tanh in bf16 on v6e/v7x, f32 on v5e.
    w2 = w2_ref[...]            # (64, 64) bf16, resident
    b2 = b2_ref[...]            # (64, 1)  f32
    for _ in range(3):
        z = jnp.dot(w2,
                    h if bf16_act else h.astype(jnp.bfloat16),
                    preferred_element_type=jnp.float32) + b2
        h = jnp.tanh(z.astype(jnp.bfloat16)) if bf16_act else jnp.tanh(z)

    # Output projection (2, 64) @ (64, TB): M=2 is a degenerate MXU push stream,
    # so do it on the VPU (broadcast mul) + XLU (sublane reduce) instead.
    hf = h.astype(jnp.float32)
    wot = wot_ref[...]                                          # (64, 2) f32
    re = jnp.sum(wot[:, 0:1] * hf, axis=0, keepdims=True)       # (1, TB)
    im = jnp.sum(wot[:, 1:2] * hf, axis=0, keepdims=True)       # (1, TB)
    out_ref[...] = jnp.concatenate([re, im], axis=0) + bo_ref[...]


def _round_up(n, m):
    return ((n + m - 1) // m) * m


def complex_network_forward(x, params, tile_b=8192, bf16_act=None):
    """x: (B, 1) float32 -> complex64 of shape (B,)."""
    w1, b1, w2, b2, wo, bo = params
    B = x.shape[0]

    # bf16 tanh only where the EUP/VPU natively handle bf16 (v6e / v7x).
    if bf16_act is None:
        try:
            kind = jax.devices()[0].device_kind.lower()
        except Exception:  # pragma: no cover
            kind = ""
        bf16_act = ("v6" in kind) or ("v7" in kind)

    # Lane-dense layout: batch on the lane axis.
    xt = x.reshape(1, B)

    # Tile size on the lane axis: multiple of 128, capped by tile_b and by
    # round_up(B/2, 128) so there are always >= 2 tiles when B allows it
    # (v7x megacore sharding of the "parallel" batch axis).
    TB = max(128, min(tile_b, _round_up(pl.cdiv(B, 2), 128)))
    n_tiles = pl.cdiv(B, TB)
    B_pad = n_tiles * TB
    if B_pad != B:
        xt = jnp.pad(xt, ((0, 0), (0, B_pad - B)))

    # Pre-cast matmul weights to bf16 once (MXU-native); biases stay f32.
    # Output weight is passed transposed (64, 2) f32 for the VPU/XLU path.
    w2b = w2.astype(jnp.bfloat16)
    wot = wo.T.astype(jnp.float32)

    # Weights/biases resident in VMEM for every grid step.
    resident = lambda shape: pl.BlockSpec(shape, lambda i: (0,) * len(shape))

    # Advisory cost: compute-heavy, trivial bytes.
    flops = (3 * 2 * 64 * 64 + 2 * 64 + 2 * 2 * 64) * B_pad
    transcendentals = 4 * 64 * B_pad
    bytes_accessed = 12 * B_pad + (64 + 64 + 64 * 64 * 2 + 64 * 4 + 64 * 2 * 4 + 2 * 4)

    kernel = functools.partial(_mlp_kernel, bf16_act=bf16_act)

    out = pl.pallas_call(
        kernel,
        out_shape=jax.ShapeDtypeStruct((2, B_pad), jnp.float32),
        grid=(n_tiles,),
        in_specs=[
            pl.BlockSpec((1, TB), lambda i: (0, i)),   # x tile, lane-dense
            resident(w1.shape),                        # (64, 1)  f32
            resident(b1.shape),                        # (64, 1)  f32
            resident(w2b.shape),                       # (64, 64) bf16
            resident(b2.shape),                        # (64, 1)  f32
            resident(wot.shape),                       # (64, 2)  f32
            resident(bo.shape),                        # (2, 1)   f32
        ],
        out_specs=pl.BlockSpec((2, TB), lambda i: (0, i)),
        compiler_params=pltpu.CompilerParams(
            dimension_semantics=("parallel",),
            vmem_limit_bytes=32 * 1024 * 1024,
        ),
        cost_estimate=pl.CostEstimate(
            flops=flops,
            transcendentals=transcendentals,
            bytes_accessed=bytes_accessed,
        ),
    )(xt, w1, b1, w2b, b2, wot, bo)

    out = out[:, :B]
    # torch.complex(re, im) equivalent (done in JAX glue; no complex dtype in-kernel).
    return jax.lax.complex(out[0], out[1])


def init_params(key):
    """PyTorch-default-style init. Weights kept in PyTorch (out_features, in_features)
    layout because the kernel computes W @ h with features on the sublane axis.
    Biases are stored as (out_features, 1) columns."""
    k1, k2, k3, k4, k5, k6 = jax.random.split(key, 6)

    def uni(k, shape, fan_in):
        bound = 1.0 / jnp.sqrt(jnp.float32(fan_in))
        return jax.random.uniform(
            k, shape, dtype=jnp.float32, minval=-bound, maxval=bound
        )

    w1 = uni(k1, (64, 1), 1)
    b1 = uni(k2, (64, 1), 1)
    w2 = uni(k3, (64, 64), 64)
    b2 = uni(k4, (64, 1), 64)
    wo = uni(k5, (2, 64), 64)
    bo = uni(k6, (2, 1), 64)
    return (w1, b1, w2, b2, wo, bo)


def _reference(x, params):
    """Pure-JAX f32 reference (matches the PyTorch forward)."""
    w1, b1, w2, b2, wo, bo = params
    h = jnp.tanh(x @ w1.T + b1.T)          # (B, 64)
    for _ in range(3):
        h = jnp.tanh(h @ w2.T + b2.T)
    o = h @ wo.T + bo.T                    # (B, 2)
    return jax.lax.complex(o[:, 0], o[:, 1])


if __name__ == "__main__":
    key = jax.random.PRNGKey(0)
    pkey, xkey = jax.random.split(key)
    params = init_params(pkey)

    B = 8
    x = jax.random.normal(xkey, (B, 1), dtype=jnp.float32)

    fwd = jax.jit(functools.partial(complex_network_forward, tile_b=8192))
    y = jax.block_until_ready(fwd(x, params))

    y_ref = _reference(x, params)
    assert y.shape == (B,)
    assert y.dtype == jnp.complex64
    # bf16 MXU matmuls / bf16 tanh (f32 accumulation) -> relaxed tolerance vs f32 ref.
    assert jnp.allclose(y, y_ref, atol=5e-2, rtol=5e-2), (y, y_ref)

    print("KERNEL_OK")
</pallas_src>

<mosaic_0001>
module attributes {stable_mosaic.version = 11 : i64} {
  func.func @_mlp_kernel(%arg0: i32, %arg1: memref<1x128xf32, #tpu.memory_space<vmem>>, %arg2: memref<64x1xf32, #tpu.memory_space<vmem>>, %arg3: memref<64x1xf32, #tpu.memory_space<vmem>>, %arg4: memref<64x64xbf16, #tpu.memory_space<vmem>>, %arg5: memref<64x1xf32, #tpu.memory_space<vmem>>, %arg6: memref<64x2xf32, #tpu.memory_space<vmem>>, %arg7: memref<2x1xf32, #tpu.memory_space<vmem>>, %arg8: memref<2x128xf32, #tpu.memory_space<vmem>>) attributes {dimension_semantics = [#tpu.dimension_semantics<parallel>], iteration_bounds = array<i64: 1>, scalar_prefetch = 0 : i64, scratch_operands = 0 : i64, tpu.core_type = #tpu.core_type<tc>, window_params = [{transform_indices = @transform_0, window_bounds = array<i64: 1, 128>}, {pipeline_mode = #tpu.pipeline_mode<synchronous>, transform_indices = @transform_1, window_bounds = array<i64: 64, 1>}, {pipeline_mode = #tpu.pipeline_mode<synchronous>, transform_indices = @transform_2, window_bounds = array<i64: 64, 1>}, {pipeline_mode = #tpu.pipeline_mode<synchronous>, transform_indices = @transform_3, window_bounds = array<i64: 64, 64>}, {pipeline_mode = #tpu.pipeline_mode<synchronous>, transform_indices = @transform_4, window_bounds = array<i64: 64, 1>}, {pipeline_mode = #tpu.pipeline_mode<synchronous>, transform_indices = @transform_5, window_bounds = array<i64: 64, 2>}, {pipeline_mode = #tpu.pipeline_mode<synchronous>, transform_indices = @transform_6, window_bounds = array<i64: 2, 1>}, {transform_indices = @transform_7, window_bounds = array<i64: 2, 128>}]} {
    %c0 = arith.constant 0 : index
    %c0_0 = arith.constant 0 : index
    %0 = vector.load %arg1[%c0, %c0_0] : memref<1x128xf32, #tpu.memory_space<vmem>>, vector<1x128xf32>
    %c0_1 = arith.constant 0 : index
    %c0_2 = arith.constant 0 : index
    %1 = vector.load %arg2[%c0_1, %c0_2] : memref<64x1xf32, #tpu.memory_space<vmem>>, vector<64x1xf32>
    %2 = vector.broadcast %1 : vector<64x1xf32> to vector<64x128xf32>
    %3 = vector.broadcast %0 : vector<1x128xf32> to vector<64x128xf32>
    %4 = arith.mulf %2, %3 : vector<64x128xf32>
    %c0_3 = arith.constant 0 : index
    %c0_4 = arith.constant 0 : index
    %5 = vector.load %arg3[%c0_3, %c0_4] : memref<64x1xf32, #tpu.memory_space<vmem>>, vector<64x1xf32>
    %6 = vector.broadcast %5 : vector<64x1xf32> to vector<64x128xf32>
    %7 = arith.addf %4, %6 : vector<64x128xf32>
    %8 = math.tanh %7 : vector<64x128xf32>
    %c0_5 = arith.constant 0 : index
    %c0_6 = arith.constant 0 : index
    %9 = vector.load %arg4[%c0_5, %c0_6] : memref<64x64xbf16, #tpu.memory_space<vmem>>, vector<64x64xbf16>
    %c0_7 = arith.constant 0 : index
    %c0_8 = arith.constant 0 : index
    %10 = vector.load %arg5[%c0_7, %c0_8] : memref<64x1xf32, #tpu.memory_space<vmem>>, vector<64x1xf32>
    %11 = arith.truncf %8 : vector<64x128xf32> to vector<64x128xbf16>
    %cst = arith.constant dense<0.000000e+00> : vector<64x128xf32>
    %12 = tpu.matmul %9, %11, %cst {dimension_numbers = #tpu.dot_dimension_numbers<[1], [0], [0], [1], [0, 0, 1, 1], [], []>} : vector<64x64xbf16>, vector<64x128xbf16>, vector<64x128xf32> -> vector<64x128xf32>
    %13 = vector.broadcast %10 : vector<64x1xf32> to vector<64x128xf32>
    %14 = arith.addf %12, %13 : vector<64x128xf32>
    %15 = math.tanh %14 : vector<64x128xf32>
    %16 = arith.truncf %15 : vector<64x128xf32> to vector<64x128xbf16>
    %cst_9 = arith.constant dense<0.000000e+00> : vector<64x128xf32>
    %17 = tpu.matmul %9, %16, %cst_9 {dimension_numbers = #tpu.dot_dimension_numbers<[1], [0], [0], [1], [0, 0, 1, 1], [], []>} : vector<64x64xbf16>, vector<64x128xbf16>, vector<64x128xf32> -> vector<64x128xf32>
    %18 = vector.broadcast %10 : vector<64x1xf32> to vector<64x128xf32>
    %19 = arith.addf %17, %18 : vector<64x128xf32>
    %20 = math.tanh %19 : vector<64x128xf32>
    %21 = arith.truncf %20 : vector<64x128xf32> to vector<64x128xbf16>
    %cst_10 = arith.constant dense<0.000000e+00> : vector<64x128xf32>
    %22 = tpu.matmul %9, %21, %cst_10 {dimension_numbers = #tpu.dot_dimension_numbers<[1], [0], [0], [1], [0, 0, 1, 1], [], []>} : vector<64x64xbf16>, vector<64x128xbf16>, vector<64x128xf32> -> vector<64x128xf32>
    %23 = vector.broadcast %10 : vector<64x1xf32> to vector<64x128xf32>
    %24 = arith.addf %22, %23 : vector<64x128xf32>
    %25 = math.tanh %24 : vector<64x128xf32>
    %c0_11 = arith.constant 0 : index
    %c0_12 = arith.constant 0 : index
    %26 = vector.load %arg6[%c0_11, %c0_12] : memref<64x2xf32, #tpu.memory_space<vmem>>, vector<64x2xf32>
    %27 = vector.extract_strided_slice %26 {offsets = [0, 0], sizes = [64, 1], strides = [1, 1]} : vector<64x2xf32> to vector<64x1xf32>
    %28 = vector.broadcast %27 : vector<64x1xf32> to vector<64x128xf32>
    %29 = arith.mulf %28, %25 : vector<64x128xf32>
    %cst_13 = arith.constant dense<0.000000e+00> : vector<128xf32>
    %30 = vector.multi_reduction <add>, %29, %cst_13 [0] : vector<64x128xf32> to vector<128xf32>
    %31 = vector.shape_cast %30 : vector<128xf32> to vector<1x128xf32>
    %32 = vector.extract_strided_slice %26 {offsets = [0, 1], sizes = [64, 1], strides = [1, 1]} : vector<64x2xf32> to vector<64x1xf32>
    %33 = vector.broadcast %32 : vector<64x1xf32> to vector<64x128xf32>
    %34 = arith.mulf %33, %25 : vector<64x128xf32>
    %cst_14 = arith.constant dense<0.000000e+00> : vector<128xf32>
    %35 = vector.multi_reduction <add>, %34, %cst_14 [0] : vector<64x128xf32> to vector<128xf32>
    %36 = vector.shape_cast %35 : vector<128xf32> to vector<1x128xf32>
    %37 = tpu.concatenate %31, %36 in 0 : vector<1x128xf32>, vector<1x128xf32> -> vector<2x128xf32>
    %c0_15 = arith.constant 0 : index
    %c0_16 = arith.constant 0 : index
    %38 = vector.load %arg7[%c0_15, %c0_16] : memref<2x1xf32, #tpu.memory_space<vmem>>, vector<2x1xf32>
    %39 = vector.broadcast %38 : vector<2x1xf32> to vector<2x128xf32>
    %40 = arith.addf %37, %39 : vector<2x128xf32>
    %c0_17 = arith.constant 0 : index
    %c0_18 = arith.constant 0 : index
    %41 = vector.load %arg8[%c0_17, %c0_18] : memref<2x128xf32, #tpu.memory_space<vmem>>, vector<2x128xf32>
    tpu.vector_store %arg8[%c0_17, %c0_18], %40 {strides = array<i32>} : memref<2x128xf32, #tpu.memory_space<vmem>>, vector<2x128xf32>,
    return
  }
  func.func @transform_0(%arg0: i32) -> (i32, i32) {
    %c0_i32 = arith.constant 0 : i32
    %c0_i32_0 = arith.constant 0 : i32
    return %c0_i32, %arg0 : i32, i32
  }
  func.func @transform_1(%arg0: i32) -> (i32, i32) {
    %c0_i32 = arith.constant 0 : i32
    %c0_i32_0 = arith.constant 0 : i32
    %c0_i32_1 = arith.constant 0 : i32
    return %c0_i32, %c0_i32_0 : i32, i32
  }
  func.func @transform_2(%arg0: i32) -> (i32, i32) {
    %c0_i32 = arith.constant 0 : i32
    %c0_i32_0 = arith.constant 0 : i32
    %c0_i32_1 = arith.constant 0 : i32
    return %c0_i32, %c0_i32_0 : i32, i32
  }
  func.func @transform_3(%arg0: i32) -> (i32, i32) {
    %c0_i32 = arith.constant 0 : i32
    %c0_i32_0 = arith.constant 0 : i32
    %c0_i32_1 = arith.constant 0 : i32
    return %c0_i32, %c0_i32_0 : i32, i32
  }
  func.func @transform_4(%arg0: i32) -> (i32, i32) {
    %c0_i32 = arith.constant 0 : i32
    %c0_i32_0 = arith.constant 0 : i32
    %c0_i32_1 = arith.constant 0 : i32
    return %c0_i32, %c0_i32_0 : i32, i32
  }
  func.func @transform_5(%arg0: i32) -> (i32, i32) {
    %c0_i32 = arith.constant 0 : i32
    %c0_i32_0 = arith.constant 0 : i32
    %c0_i32_1 = arith.constant 0 : i32
    return %c0_i32, %c0_i32_0 : i32, i32
  }
  func.func @transform_6(%arg0: i32) -> (i32, i32) {
    %c0_i32 = arith.constant 0 : i32
    %c0_i32_0 = arith.constant 0 : i32
    %c0_i32_1 = arith.constant 0 : i32
    return %c0_i32, %c0_i32_0 : i32, i32
  }
  func.func @transform_7(%arg0: i32) -> (i32, i32) {
    %c0_i32 = arith.constant 0 : i32
    %c0_i32_0 = arith.constant 0 : i32
    return %c0_i32, %arg0 : i32, i32
  }
}

</mosaic_0001>

<bundles_post_ra>
// kernel: custom-call
= control target key start
LH: loop header
LB: loop body
LE: loop exit
PB: predicated region body
PF: predicated region fallthrough
CT: control target
= control target key end

     0   :  { %s126_s0 = inlined_call_operand.vmem [shape: f32[8], index: 0, kind: input, shape index: {}]   ;;  %s127_s1 = inlined_call_operand.vmem [shape: f32[8], index: 1, kind: input, shape index: {}]   ;;  %s128_s2 = inlined_call_operand.hbm [shape: c64[8], index: 2, kind: output, shape index: {}]  }
   0x1   :  { %s87_s11 = scalar_lea.hbm %s128_s2, 16 }
   0x2   :  { %4 = vsyncpa [#allocation0], 0  ;;  %s5_s14 = sshll.u32 %s126_s0, 4  ;;  %s6_s14 = int_to_ptr.vmem [resolvable:$true] %s5_s14 }
   0x3   :  { %s18_s15 = scalar_lea.vmem %s6_s14, 16  ;;  %p23_p1 = scmp.lt.s32.totalorder %s6_s14, %s6_s14 }
   0x4   :  { %p19_p0 = scmp.ne.s32.totalorder %s6_s14, %s18_s15  ;;  %p24_p2 = scmp.lt.s32.totalorder %s18_s15, %s18_s15 }
   0x6   :  { %p25_p3 = por %p24_p2, %p23_p1 }
   0x8   :  { %p26_p4 = pnand %p25_p3, %p19_p0 }
   0xa   :  { %29 = shalt.err (!%p26_p4)  }
   0xb   :  { %p31_p5 = scmp.ne.s32.totalorder %s128_s2, %s87_s11  ;;  %s32_s0 = scalar_lea.hbm %s128_s2, 32 }
   0xc   :  { %p33_p6 = scmp.lt.u32.totalorder %s32_s0, %s87_s11  ;;  %p34_p7 = scmp.lt.u32.totalorder %s87_s11, %s128_s2 }
   0xe   :  { %p35_p8 = por %p34_p7, %p33_p6 }
  0x10   :  { %p36_p9 = pnand %p35_p8, %p31_p5 }
  0x12   :  { %39 = shalt.err (!%p36_p9)  }
  0x13   :  { %8 = dma.vmem_to_hbm [thread:$0]  %s6_s14, 16, %s128_s2, [#allocation0] }
  0x14   :  { %65 = dma.done.wait [#allocation0], 16  }
  0x15   :  { %66 = vsyncadd [#allocation0], 4294967280 }
  0x16   :  { %10 = vsyncpa [#allocation0], 1 }
  0x17   :  { %11 = vsyncpa [#allocation1], 0  ;;  %s12_s28 = sshll.u32 %s127_s1, 4  ;;  %s13_s28 = int_to_ptr.vmem [resolvable:$true] %s12_s28 }
  0x18   :  { %s40_s29 = scalar_lea.vmem %s13_s28, 16  ;;  %p45_p11 = scmp.lt.s32.totalorder %s13_s28, %s13_s28 }
  0x19   :  { %p41_p10 = scmp.ne.s32.totalorder %s13_s28, %s40_s29  ;;  %p46_p12 = scmp.lt.s32.totalorder %s40_s29, %s40_s29 }
  0x1b   :  { %p47_p13 = por %p46_p12, %p45_p11 }
  0x1d   :  { %p48_p0 = pnand %p47_p13, %p41_p10 }
  0x1f   :  { %51 = shalt.err (!%p48_p0)  }
  0x20   :  { %p53_p1 = scmp.ne.s32.totalorder %s87_s11, %s32_s0  ;;  %p56_p2 = scmp.lt.u32.totalorder %s32_s0, %s32_s0 }
  0x22   :  { %p57_p3 = por %p56_p2, %p34_p7 }
  0x24   :  { %p59_p4 = por %p57_p3, %p33_p6 }
  0x26   :  { %p60_p5 = pnand %p59_p4, %p53_p1 }
  0x28   :  { %63 = shalt.err (!%p60_p5)  }
  0x29   :  { %15 = dma.vmem_to_hbm [thread:$0]  %s13_s28, 16, %s87_s11, [#allocation1] }
  0x2a   :  { %67 = dma.done.wait [#allocation1], 16  }
  0x2b   :  { %68 = vsyncadd [#allocation1], 4294967280 }
  0x2c   :  { %17 = vsyncpa [#allocation1], 1 }

// kernel: complex_network_forward.1
= control target key start
LH: loop header
LB: loop body
LE: loop exit
PB: predicated region body
PF: predicated region fallthrough
CT: control target
= control target key end

     0   :  { %v783_v0 = vmov 0   ;;  %vm234_vm0 = vcmask 523264   ;;  %vm596_vm1 = vcmask 1040384   ;;  %s1021_s2 = inlined_call_operand.vmem [shape: f32[64,1], index: 2, kind: input, shape index: {}]   ;;  %s1022_s1 = inlined_call_operand.vmem [shape: f32[64,1], index: 1, kind: input, shape index: {}]   ;;  %s1023_s4 = inlined_call_operand.vmem [shape: f32[64,1], index: 4, kind: input, shape index: {}]   ;;  %s1024_s5 = inlined_call_operand.vmem [shape: f32[64,2], index: 5, kind: input, shape index: {}]   ;;  %s1025_s3 = inlined_call_operand.vmem [shape: bf16[64,64], index: 3, kind: input, shape index: {}]   ;;  %s1026_s0 = inlined_call_operand.vmem [shape: f32[1,128], index: 0, kind: input, shape index: {}]   ;;  %s1027_s6 = inlined_call_operand.vmem [shape: f32[2,1], index: 6, kind: input, shape index: {}]   ;;  %s1028_s7 = inlined_call_operand.vmem [shape: f32[2,128], index: 7, kind: output, shape index: {}]  }
   0x1   :  { %710 = vset.pattern.permute.xlu1 %v783_v0  ;;  %709 = vset.pattern.permute.xlu0 %v783_v0  ;;  %v90_v1 = vld [vmem:[%s1021_s2] sm:$0xff]  ;;  %v91_v3 = vld [vmem:[%s1021_s2 + $0x8] sm:$0xff]  ;;  %v31_v5 = vld [vmem:[%s1022_s1 + $0x18] sm:$0xff] }
   0x2   :  { %v28_v2 = vld [vmem:[%s1022_s1] sm:$0xff]  ;;  %100 = vperm.xlu1 %710, %v90_v1   ;;  %v29_v4 = vld [vmem:[%s1022_s1 + $0x8] sm:$0xff]  ;;  %v30_v6 = vld [vmem:[%s1022_s1 + $0x10] sm:$0xff] }
   0x3   :  { %38 = vperm.xlu0 %709, %v28_v2   ;;  %v93_v7 = vld [vmem:[%s1021_s2 + $0x18] sm:$0xff]  ;;  %v92_v8 = vld [vmem:[%s1021_s2 + $0x10] sm:$0xff]  ;;  %v33_v9 = vld [vmem:[%s1022_s1 + $0x28] sm:$0xff] }
   0x4   :  { %v32_v10 = vld [vmem:[%s1022_s1 + $0x20] sm:$0xff]  ;;  %v95_v11 = vld [vmem:[%s1021_s2 + $0x28] sm:$0xff]  ;;  %v35_v13 = vld [vmem:[%s1022_s1 + $0x38] sm:$0xff] }
   0x5   :  { %v94_v12 = vld [vmem:[%s1021_s2 + $0x20] sm:$0xff]  ;;  %v34_v14 = vld [vmem:[%s1022_s1 + $0x30] sm:$0xff]  ;;  %v97_v15 = vld [vmem:[%s1021_s2 + $0x38] sm:$0xff] }
   0x6   :  { %105 = vperm.xlu1 %710, %v91_v3   ;;  %v96_v16 = vld [vmem:[%s1021_s2 + $0x30] sm:$0xff]  ;;  %v163_v17 = vld [vmem:[%s1023_s4 + $0x8] sm:$0xff]  ;;  %v162_v18 = vld [vmem:[%s1023_s4] sm:$0xff] }
   0x7   :  { %43 = vperm.xlu0 %709, %v29_v4   ;;  %v165_v19 = vld [vmem:[%s1023_s4 + $0x18] sm:$0xff]  ;;  %v164_v20 = vld [vmem:[%s1023_s4 + $0x10] sm:$0xff]  ;;  %v167_v21 = vld [vmem:[%s1023_s4 + $0x28] sm:$0xff] }
   0x8   :  { %v166_v22 = vld [vmem:[%s1023_s4 + $0x20] sm:$0xff]  ;;  %v169_v23 = vld [vmem:[%s1023_s4 + $0x38] sm:$0xff]  ;;  %v168_v24 = vld [vmem:[%s1023_s4 + $0x30] sm:$0xff] }
   0x9   :  { %v902_v25 = vld [vmem:[%s1024_s5 + $0x8] sm:$0xff]  ;;  %v907_v26 = vld [vmem:[%s1024_s5] sm:$0xff] }
   0xa   :  { %53 = vperm.xlu1 %710, %v31_v5   ;;  %v912_v27 = vld [vmem:[%s1025_s3] sm:$0xff]  }
   0xb   :  { %48 = vperm.xlu0 %709, %v30_v6   ;;  %659 = vmatprep.mubr.msk.bf16.mxu0 %vm234_vm0, %v912_v27  ;;  %v610_v28 = vld [vmem:[%s1026_s0] ss:$0 sm:$0xff] }
   0xc   :  { %675 = vmatprep.mubr.msk.bf16.mxu1 %vm234_vm0, %v912_v27 }
   0xe   :  { %115 = vperm.xlu1 %710, %v93_v7  }
   0xf   :  { %110 = vperm.xlu0 %709, %v92_v8  }
  0x12   :  { %63 = vperm.xlu1 %710, %v33_v9  }
  0x13   :  { %58 = vperm.xlu0 %709, %v32_v10   ;;  %v926_v10 = vld [vmem:[%s1025_s3 + $0x8] sm:$0xff]  }
  0x16   :  { %125 = vperm.xlu1 %710, %v95_v11   ;;  %v717_v11 = vld [vmem:[%s1025_s3 + $0x10] sm:$0xff]  }
  0x17   :  { %120 = vperm.xlu0 %709, %v94_v12   ;;  %v937_v12 = vld [vmem:[%s1025_s3 + $0x18] sm:$0xff]  }
  0x1a   :  { %73 = vperm.xlu1 %710, %v35_v13  }
  0x1b   :  { %68 = vperm.xlu0 %709, %v34_v14  }
  0x1e   :  { %135 = vperm.xlu1 %710, %v97_v15  }
  0x1f   :  { %130 = vperm.xlu0 %709, %v96_v16  }
  0x22   :  { %181 = vperm.xlu1 %710, %v163_v17  }
  0x23   :  { %176 = vperm.xlu0 %709, %v162_v18  }
  0x26   :  { %191 = vperm.xlu1 %710, %v165_v19  }
  0x27   :  { %186 = vperm.xlu0 %709, %v164_v20  }
  0x2a   :  { %201 = vperm.xlu1 %710, %v167_v21  }
  0x2b   :  { %196 = vperm.xlu0 %709, %v166_v22  }
  0x2e   :  { %211 = vperm.xlu1 %710, %v169_v23  }
  0x2f   :  { %206 = vperm.xlu0 %709, %v168_v24  }
  0x32   :  { %489 = vperm.xlu1 %710, %v902_v25  }
  0x33   :  { %484 = vperm.xlu0 %709, %v907_v26  }
  0x81   :  { %v101_v29 = vpop.permute.xlu1 %100 }
  0x82   :  { %v39_v30 = vpop.permute.xlu0 %38 }
  0x83   :  { %v82_v31 = vmul.f32 %v610_v28, %v39_v30 }
  0x85   :  { %v138_v32 = vadd.f32 %v101_v29, %v82_v31  ;;  %v106_v33 = vpop.permute.xlu1 %105 }
  0x86   :  { %v44_v34 = vpop.permute.xlu0 %43 }
  0x87   :  { %v83_v35 = vmul.f32 %v610_v28, %v44_v34  ;;  %719 = vtanh.f32 %v138_v32 }
  0x89   :  { %v139_v36 = vadd.f32 %v106_v33, %v83_v35  ;;  %v54_v37 = vpop.permute.xlu1 %53 }
  0x8a   :  { %v49_v38 = vpop.permute.xlu0 %48  ;;  %v85_v39 = vmul.f32 %v610_v28, %v54_v37 }
  0x8b   :  { %721 = vtanh.f32 %v139_v36  ;;  %v84_v40 = vmul.f32 %v610_v28, %v49_v38 }
  0x8d   :  { %v116_v41 = vpop.permute.xlu1 %115 }
  0x8e   :  { %v111_v42 = vpop.permute.xlu0 %110  ;;  %v141_v43 = vadd.f32 %v116_v41, %v85_v39 }
  0x8f   :  { %v140_v44 = vadd.f32 %v111_v42, %v84_v40 }
  0x90   :  { %723 = vtanh.f32 %v141_v43 }
  0x91   :  { %725 = vtanh.f32 %v140_v44  ;;  %v64_v45 = vpop.permute.xlu1 %63  ;;  %v720_v47 = vpop.eup %719 }
  0x92   :  { %v59_v46 = vpop.permute.xlu0 %58  ;;  %v87_v49 = vmul.f32 %v610_v28, %v64_v45 }
  0x93   :  { %v86_v50 = vmul.f32 %v610_v28, %v59_v46 }
  0x95   :  { %v722_v48 = vpop.eup %721  ;;  %v126_v51 = vpop.permute.xlu1 %125 }
  0x96   :  { %v121_v52 = vpop.permute.xlu0 %120  ;;  %v170_v53 = vpack.c.bf16 %v722_v48, %v720_v47  ;;  %v143_v54 = vadd.f32 %v126_v51, %v87_v49  ;;  %v784_v51 = vmov 1  }
  0x97   :  { %v142_v55 = vadd.f32 %v121_v52, %v86_v50  ;;  %712 = vset.pattern.permute.xlu1 %v784_v51  ;;  %711 = vset.pattern.permute.xlu0 %v784_v51  ;;  %v476_v52 = vld [vmem:[%s1024_s5 + $0x10] sm:$0xff] }
  0x98   :  { %651 = vmatprep.subr.bf16.mxu0 %v170_v53  ;;  %727 = vtanh.f32 %v143_v54  ;;  %548 = vperm.xlu1 %712, %v902_v25   ;;  %v478_v25 = vld [vmem:[%s1024_s5 + $0x20] sm:$0xff]  ;;  %v480_v54 = vld [vmem:[%s1024_s5 + $0x30] sm:$0xff] }
  0x99   :  { %652 = vmatpush3.bf16.msra.mxu0 %v170_v53  ;;  %729 = vtanh.f32 %v142_v55  ;;  %v74_v56 = vpop.permute.xlu1 %73  ;;  %544 = vperm.xlu0 %711, %v907_v26   ;;  %v477_v53 = vld [vmem:[%s1024_s5 + $0x18] sm:$0xff]  ;;  %v479_v26 = vld [vmem:[%s1024_s5 + $0x28] sm:$0xff] }
  0x9a   :  { %v69_v57 = vpop.permute.xlu0 %68  ;;  %v724_v58 = vpop.eup %723  ;;  %v89_v60 = vmul.f32 %v610_v28, %v74_v56  ;;  %v481_v55 = vld [vmem:[%s1024_s5 + $0x38] sm:$0xff]  ;;  %v598_v56 = vld [vmem:[%s1027_s6] sm:$0x3] }
  0x9b   :  { %v726_v59 = vpop.eup %725  ;;  %v88_v61 = vmul.f32 %v610_v28, %v69_v57 }
  0x9c   :  { %v171_v62 = vpack.c.bf16 %v724_v58, %v726_v59  ;;  %713 = vset.pattern.permute.xlu1 %v783_v0 }
  0x9d   :  { %v136_v63 = vpop.permute.xlu1 %135  ;;  %552 = vperm.xlu0 %711, %v476_v52   ;;  %494 = vperm.xlu1 %713, %v476_v52  }
  0x9e   :  { %v131_v1 = vpop.permute.xlu0 %130  ;;  %v145_v2 = vadd.f32 %v136_v63, %v89_v60  ;;  %653 = vmatprep.subr.bf16.mxu0 %v171_v62 }
  0x9f   :  { %v144_v3 = vadd.f32 %v131_v1, %v88_v61  ;;  %654 = vmatpush3.bf16.msra.mxu0 %v171_v62 }
  0xa0   :  { %731 = vtanh.f32 %v145_v2 }
  0xa1   :  { %733 = vtanh.f32 %v144_v3  ;;  %v945_v14 = vpop.permute.xlu1 %181  ;;  %556 = vperm.xlu0 %711, %v477_v53   ;;  %499 = vperm.xlu1 %713, %v477_v53  }
  0xa2   :  { %v728_v4 = vpop.eup %727  ;;  %v943_v13 = vpop.permute.xlu0 %176 }
  0xa3   :  { %v730_v5 = vpop.eup %729 }
  0xa4   :  { %v172_v6 = vpack.c.bf16 %v728_v4, %v730_v5 }
  0xa5   :  { %v949_v16 = vpop.permute.xlu1 %191  ;;  %560 = vperm.xlu0 %711, %v478_v25   ;;  %504 = vperm.xlu1 %713, %v478_v25  }
  0xa6   :  { %655 = vmatprep.subr.bf16.mxu0 %v172_v6  ;;  %v947_v15 = vpop.permute.xlu0 %186 }
  0xa7   :  { %656 = vmatpush3.bf16.msra.mxu0 %v172_v6 }
  0xa9   :  { %564 = vperm.xlu0 %711, %v479_v26   ;;  %509 = vperm.xlu1 %713, %v479_v26  }
  0xaa   :  { %v732_v7 = vpop.eup %731  ;;  %v952_v20 = vpop.permute.xlu0 %196 }
  0xab   :  { %v734_v8 = vpop.eup %733 }
  0xac   :  { %v173_v9 = vpack.c.bf16 %v732_v7, %v734_v8 }
  0xad   :  { %568 = vperm.xlu0 %711, %v480_v54   ;;  %514 = vperm.xlu1 %713, %v480_v54  }
  0xae   :  { %657 = vmatprep.subr.bf16.mxu0 %v173_v9  ;;  %v959_v29 = vpop.permute.xlu0 %206 }
  0xaf   :  { %658 = vmatpush3.bf16.msra.mxu0 %v173_v9 }
  0xb1   :  { %572 = vperm.xlu0 %711, %v481_v55   ;;  %519 = vperm.xlu1 %713, %v481_v55  }
  0xb2   :  { %660 = vmatmul.mubr.msk.bf16.vlgmr.msra.gmra.mrb[0].mxu0 %vm234_vm0, %v926_v10 }
  0xb3   :  { %663 = vmatprep.mubr.msk.bf16.mxu0 %vm234_vm0, %v717_v11 }
  0xb5   :  { %714 = vset.pattern.permute.xlu0 %v783_v0  ;;  %601 = vperm.xlu1 %713, %v598_v56  }
  0xba   :  { %664 = vmatmul.mubr.msk.bf16.gmra.mrb[4].mxu0 %vm234_vm0, %v937_v12 }
  0xbb   :  { %691 = vmatprep.mubr.msk.bf16.mxu0 %vm234_vm0, %v912_v27  ;;  %v956_v27 = vpop.permute.xlu1 %201 }
  0xbf   :  { %v962_v33 = vpop.permute.xlu1 %211 }
 0x185   :  { %v661_v17 = vpop.f32.mrb[0].mxu0 }
 0x186   :  { %v290_v18 = vadd.f32 %v661_v17, %v947_v15  ;;  %v281_v19 = vpop.f32.mrb[1].mxu0 }
 0x187   :  { %v282_v21 = vadd.f32 %v281_v19, %v943_v13  ;;  %v662_v22 = vpop.f32.mrb[2].mxu0 }
 0x188   :  { %735 = vtanh.f32 %v290_v18  ;;  %v293_v23 = vadd.f32 %v662_v22, %v949_v16  ;;  %v284_v24 = vpop.f32.mrb[3].mxu0 }
 0x189   :  { %737 = vtanh.f32 %v282_v21  ;;  %v285_v28 = vadd.f32 %v284_v24, %v945_v14 }
 0x18a   :  { %739 = vtanh.f32 %v293_v23 }
 0x18b   :  { %741 = vtanh.f32 %v285_v28 }
 0x18d   :  { %v665_v30 = vpop.f32.mrb[4].mxu0 }
 0x18e   :  { %v306_v31 = vadd.f32 %v665_v30, %v959_v29  ;;  %v297_v32 = vpop.f32.mrb[5].mxu0 }
 0x18f   :  { %v298_v34 = vadd.f32 %v297_v32, %v952_v20  ;;  %v666_v35 = vpop.f32.mrb[6].mxu0  ;;  %v490_v32 = vpop.permute.xlu1 %489 }
 0x190   :  { %743 = vtanh.f32 %v306_v31  ;;  %v309_v36 = vadd.f32 %v666_v35, %v962_v33  ;;  %v300_v37 = vpop.f32.mrb[7].mxu0 }
 0x191   :  { %745 = vtanh.f32 %v298_v34  ;;  %v301_v38 = vadd.f32 %v300_v37, %v956_v27  ;;  %v485_v34 = vpop.permute.xlu0 %484 }
 0x192   :  { %v736_v39 = vpop.eup %735  ;;  %747 = vtanh.f32 %v309_v36 }
 0x193   :  { %v738_v40 = vpop.eup %737  ;;  %749 = vtanh.f32 %v301_v38  ;;  %v549_v35 = vpop.permute.xlu1 %548 }
 0x194   :  { %v740_v41 = vpop.eup %739 }
 0x195   :  { %v742_v42 = vpop.eup %741  ;;  %v321_v43 = vpack.c.bf16 %v740_v41, %v736_v39  ;;  %v545_v36 = vpop.permute.xlu0 %544 }
 0x196   :  { %v320_v44 = vpack.c.bf16 %v742_v42, %v738_v40 }
 0x197   :  { %v495_v37 = vpop.permute.xlu1 %494 }
 0x198   :  { %667 = vmatprep.subr.bf16.mxu1 %v320_v44 }
 0x199   :  { %668 = vmatpush3.bf16.msra.mxu1 %v320_v44  ;;  %v553_v38 = vpop.permute.xlu0 %552 }
 0x19a   :  { %v744_v45 = vpop.eup %743  ;;  %669 = vmatprep.subr.bf16.mxu1 %v321_v43 }
 0x19b   :  { %v746_v46 = vpop.eup %745 }
 0x19c   :  { %v748_v47 = vpop.eup %747 }
 0x19d   :  { %v750_v48 = vpop.eup %749  ;;  %670 = vmatpush3.bf16.msra.mxu1 %v321_v43  ;;  %v323_v49 = vpack.c.bf16 %v748_v47, %v744_v45 }
 0x19e   :  { %v322_v50 = vpack.c.bf16 %v750_v48, %v746_v46  ;;  %v500_v48 = vpop.permute.xlu1 %499 }
 0x1a0   :  { %671 = vmatprep.subr.bf16.mxu1 %v322_v50 }
 0x1a1   :  { %672 = vmatpush3.bf16.msra.mxu1 %v322_v50 }
 0x1a2   :  { %673 = vmatprep.subr.bf16.mxu1 %v323_v49  ;;  %v505_v53 = vpop.permute.xlu1 %504 }
 0x1a5   :  { %674 = vmatpush3.bf16.msra.mxu1 %v323_v49  ;;  %v557_v49 = vpop.permute.xlu0 %556 }
 0x1a8   :  { %676 = vmatmul.mubr.msk.bf16.vlgmr.msra.gmra.mrb[0].mxu1 %vm234_vm0, %v926_v10 }
 0x1a9   :  { %679 = vmatprep.mubr.msk.bf16.mxu1 %vm234_vm0, %v717_v11 }
 0x1b0   :  { %680 = vmatmul.mubr.msk.bf16.gmra.mrb[4].mxu1 %vm234_vm0, %v937_v12 }
 0x1b1   :  { %695 = vmatprep.mubr.msk.bf16.mxu1 %vm234_vm0, %v717_v11 }
 0x27b   :  { %v677_v57 = vpop.f32.mrb[0].mxu1 }
 0x27c   :  { %v367_v58 = vadd.f32 %v677_v57, %v947_v15  ;;  %v358_v59 = vpop.f32.mrb[1].mxu1 }
 0x27d   :  { %v359_v60 = vadd.f32 %v358_v59, %v943_v13  ;;  %v678_v61 = vpop.f32.mrb[2].mxu1 }
 0x27e   :  { %751 = vtanh.f32 %v367_v58  ;;  %v370_v62 = vadd.f32 %v678_v61, %v949_v16  ;;  %v361_v63 = vpop.f32.mrb[3].mxu1 }
 0x27f   :  { %753 = vtanh.f32 %v359_v60  ;;  %v362_v1 = vadd.f32 %v361_v63, %v945_v14 }
 0x280   :  { %755 = vtanh.f32 %v370_v62 }
 0x281   :  { %757 = vtanh.f32 %v362_v1 }
 0x283   :  { %v681_v2 = vpop.f32.mrb[4].mxu1 }
 0x284   :  { %v383_v0 = vadd.f32 %v681_v2, %v959_v29  ;;  %v374_v3 = vpop.f32.mrb[5].mxu1 }
 0x285   :  { %v375_v4 = vadd.f32 %v374_v3, %v952_v20  ;;  %v682_v5 = vpop.f32.mrb[6].mxu1 }
 0x286   :  { %759 = vtanh.f32 %v383_v0  ;;  %v386_v6 = vadd.f32 %v682_v5, %v962_v33  ;;  %v377_v7 = vpop.f32.mrb[7].mxu1 }
 0x287   :  { %761 = vtanh.f32 %v375_v4  ;;  %v378_v8 = vadd.f32 %v377_v7, %v956_v27 }
 0x288   :  { %v752_v9 = vpop.eup %751  ;;  %763 = vtanh.f32 %v386_v6 }
 0x289   :  { %v754_v11 = vpop.eup %753  ;;  %765 = vtanh.f32 %v378_v8 }
 0x28a   :  { %v756_v17 = vpop.eup %755 }
 0x28b   :  { %v758_v18 = vpop.eup %757  ;;  %v398_v19 = vpack.c.bf16 %v756_v17, %v752_v9 }
 0x28c   :  { %v397_v21 = vpack.c.bf16 %v758_v18, %v754_v11 }
 0x28e   :  { %683 = vmatprep.subr.bf16.mxu0 %v397_v21  ;;  %699 = vmatprep.subr.bf16.mxu1 %v397_v21 }
 0x28f   :  { %684 = vmatpush3.bf16.msra.mxu0 %v397_v21  ;;  %703 = vmatpush3.bf16.msra.mxu1 %v397_v21 }
 0x290   :  { %v760_v22 = vpop.eup %759  ;;  %685 = vmatprep.subr.bf16.mxu0 %v398_v19  ;;  %700 = vmatprep.subr.bf16.mxu1 %v398_v19 }
 0x291   :  { %v762_v23 = vpop.eup %761 }
 0x292   :  { %v764_v24 = vpop.eup %763 }
 0x293   :  { %v766_v28 = vpop.eup %765  ;;  %686 = vmatpush3.bf16.msra.mxu0 %v398_v19  ;;  %704 = vmatpush3.bf16.msra.mxu1 %v398_v19  ;;  %v400_v30 = vpack.c.bf16 %v764_v24, %v760_v22 }
 0x294   :  { %v399_v31 = vpack.c.bf16 %v766_v28, %v762_v23 }
 0x296   :  { %687 = vmatprep.subr.bf16.mxu0 %v399_v31  ;;  %701 = vmatprep.subr.bf16.mxu1 %v399_v31 }
 0x297   :  { %688 = vmatpush3.bf16.msra.mxu0 %v399_v31  ;;  %705 = vmatpush3.bf16.msra.mxu1 %v399_v31 }
 0x298   :  { %689 = vmatprep.subr.bf16.mxu0 %v400_v30  ;;  %702 = vmatprep.subr.bf16.mxu1 %v400_v30 }
 0x29b   :  { %690 = vmatpush3.bf16.msra.mxu0 %v400_v30  ;;  %706 = vmatpush3.bf16.msra.mxu1 %v400_v30 }
 0x29e   :  { %692 = vmatmul.mubr.msk.bf16.vlgmr.msra.gmra.mrb[8].mxu0 %vm234_vm0, %v926_v10  ;;  %696 = vmatmul.mubr.msk.bf16.vlgmr.msra.gmra.mrb[8].mxu1 %vm234_vm0, %v937_v12 }
 0x371   :  { %v693_v39 = vpop.f32.mrb[8].mxu0  ;;  %v697_v40 = vpop.f32.mrb[8].mxu1 }
 0x372   :  { %v435_v41 = vpop.f32.mrb[9].mxu0  ;;  %v451_v42 = vpop.f32.mrb[9].mxu1  ;;  %v444_v10 = vadd.f32 %v693_v39, %v947_v15  ;;  %v460_v25 = vadd.f32 %v697_v40, %v959_v29 }
 0x373   :  { %v694_v43 = vpop.f32.mrb[10].mxu0  ;;  %v698_v44 = vpop.f32.mrb[10].mxu1  ;;  %v436_v45 = vadd.f32 %v435_v41, %v943_v13  ;;  %v452_v51 = vadd.f32 %v451_v42, %v952_v20 }
 0x374   :  { %v438_v46 = vpop.f32.mrb[11].mxu0  ;;  %v454_v47 = vpop.f32.mrb[11].mxu1  ;;  %v447_v50 = vadd.f32 %v694_v43, %v949_v16  ;;  %v463_v15 = vadd.f32 %v698_v44, %v962_v33 }
 0x375   :  { %v439_v12 = vadd.f32 %v438_v46, %v945_v14  ;;  %767 = vtanh.f32 %v436_v45  ;;  %v455_v52 = vadd.f32 %v454_v47, %v956_v27  ;;  %v561_v13 = vpop.permute.xlu0 %560  ;;  %v510_v16 = vpop.permute.xlu1 %509 }
 0x376   :  { %769 = vtanh.f32 %v444_v10 }
 0x377   :  { %771 = vtanh.f32 %v439_v12 }
 0x378   :  { %773 = vtanh.f32 %v447_v50 }
 0x379   :  { %775 = vtanh.f32 %v452_v51  ;;  %v565_v55 = vpop.permute.xlu0 %564  ;;  %v515_v3 = vpop.permute.xlu1 %514 }
 0x37a   :  { %777 = vtanh.f32 %v455_v52 }
 0x37b   :  { %779 = vtanh.f32 %v460_v25 }
 0x37c   :  { %781 = vtanh.f32 %v463_v15 }
 0x37d   :  { %v569_v4 = vpop.permute.xlu0 %568  ;;  %v520_v30 = vpop.permute.xlu1 %519 }
 0x37f   :  { %v768_v14 = vpop.eup %767 }
 0x380   :  { %v770_v26 = vpop.eup %769  ;;  %v522_v20 = vmul.f32 %v768_v14, %v485_v34  ;;  %v575_v56 = vmul.f32 %v768_v14, %v545_v36 }
 0x381   :  { %v772_v54 = vpop.eup %771  ;;  %v524_v59 = vmul.f32 %v770_v26, %v495_v37  ;;  %v577_v60 = vmul.f32 %v770_v26, %v553_v38  ;;  %v573_v31 = vpop.permute.xlu0 %572 }
 0x382   :  { %v523_v57 = vmul.f32 %v772_v54, %v490_v32  ;;  %v576_v58 = vmul.f32 %v772_v54, %v549_v35  ;;  %v774_v27 = vpop.eup %773 }
 0x383   :  { %v776_v62 = vpop.eup %775  ;;  %v525_v63 = vmul.f32 %v774_v27, %v500_v48  ;;  %v578_v33 = vmul.f32 %v774_v27, %v557_v49  ;;  %v602_v49 = vpop.permute.xlu1 %601 }
 0x384   :  { %v530_v61 = vadd.f32 %v523_v57, %v522_v20  ;;  %v583_v29 = vadd.f32 %v576_v58, %v575_v56  ;;  %v778_v0 = vpop.eup %777  ;;  %v526_v5 = vmul.f32 %v776_v62, %v505_v53  ;;  %v579_v7 = vmul.f32 %v776_v62, %v561_v13 }
 0x385   :  { %v780_v9 = vpop.eup %779  ;;  %v527_v11 = vmul.f32 %v778_v0, %v510_v16  ;;  %v580_v18 = vmul.f32 %v778_v0, %v565_v55 }
 0x386   :  { %v531_v1 = vadd.f32 %v530_v61, %v524_v59  ;;  %v584_v2 = vadd.f32 %v583_v29, %v577_v60  ;;  %v782_v21 = vpop.eup %781  ;;  %v528_v22 = vmul.f32 %v780_v9, %v515_v3  ;;  %v581_v23 = vmul.f32 %v780_v9, %v569_v4 }
 0x387   :  { %v529_v32 = vmul.f32 %v782_v21, %v520_v30  ;;  %v582_v35 = vmul.f32 %v782_v21, %v573_v31 }
 0x388   :  { %v532_v6 = vadd.f32 %v531_v1, %v525_v63  ;;  %v585_v8 = vadd.f32 %v584_v2, %v578_v33 }
 0x38a   :  { %v533_v17 = vadd.f32 %v532_v6, %v526_v5  ;;  %v586_v19 = vadd.f32 %v585_v8, %v579_v7 }
 0x38c   :  { %v534_v24 = vadd.f32 %v533_v17, %v527_v11  ;;  %v587_v28 = vadd.f32 %v586_v19, %v580_v18 }
 0x38e   :  { %v535_v34 = vadd.f32 %v534_v24, %v528_v22  ;;  %v588_v36 = vadd.f32 %v587_v28, %v581_v23 }
 0x390   :  { %v536_v37 = vadd.f32 %v535_v34, %v529_v32  ;;  %v589_v38 = vadd.f32 %v588_v36, %v582_v35 }
 0x392   :  { %v537_v39 = vrot.slane %v536_v37, 4  ;;  %v590_v40 = vrot.slane %v589_v38, 4 }
 0x394   :  { %v538_v41 = vadd.f32 %v537_v39, %v536_v37  ;;  %v591_v42 = vadd.f32 %v590_v40, %v589_v38 }
 0x396   :  { %v539_v43 = vrot.slane %v538_v41, 2  ;;  %v592_v44 = vrot.slane %v591_v42, 2 }
 0x398   :  { %v540_v45 = vadd.f32 %v539_v43, %v538_v41  ;;  %v593_v46 = vadd.f32 %v592_v44, %v591_v42 }
 0x39a   :  { %v541_v47 = vrot.slane %v540_v45, 1  ;;  %v594_v10 = vrot.slane %v593_v46, 1 }
 0x39c   :  { %v542_v12 = vadd.f32 %v541_v47, %v540_v45  ;;  %v595_v48 = vadd.f32 %v594_v10, %v593_v46 }
 0x39e   :  { %v597_v50 = vsel %vm596_vm1, %v542_v12, %v595_v48 }
 0x39f   :  { %v604_v51 = vadd.f32 %v602_v49, %v597_v50 }
 0x3a1   :  { %605 = vst [vmem:[%s1028_s7] sm:$0x3] %v604_v51 }

</bundles_post_ra>
